<compile_context>
chip_gen: v5e
topology: v5e:2x2
jax: 0.10.0
libtpu: 0.0.40
codegen_flags: <defaults>
</compile_context>

<pallas_src>
import numpy as np
import jax
import jax.numpy as jnp
from jax import lax
from jax.experimental import pallas as pl
from jax.experimental.pallas import tpu as pltpu


_MAX_T_TILE = 1024   # rows per time tile; keeps lane-dense blocks small


# --------------------------------- kernel -----------------------------------
def _make_mirror_kernel(n_arrays, precisions):
    """refs = (x_0, M_0, x_1, M_1, ..., o_0, o_1, ...).

    x_i:  (tile_t, J*C) VMEM block of the flattened input.
    M_i:  (J*C, J*C) constant signed block-permutation matrix (resident).
    o_i:  (tile_t, J*C) output block.
    One MXU matmul + one dense (unmasked) store per array per tile.
    """

    def kernel(*refs):
        for i in range(n_arrays):
            x_ref = refs[2 * i]
            m_ref = refs[2 * i + 1]
            o_ref = refs[2 * n_arrays + i]
            acc = jnp.dot(x_ref[...], m_ref[...],
                          preferred_element_type=jnp.float32,
                          precision=precisions[i])
            o_ref[...] = acc.astype(o_ref.dtype)

    return kernel


# ------------------------------ static config --------------------------------
def _signed_perm_matrix(swap, per_channel):
    """Constant (J*C, J*C) matrix M with
       (x_flat @ M)[t, j*C + c] = sum_k per_channel[c, k] * x[t, swap[j], k].
    per_channel is the 3x3 reflection matrix for positions or diag(quat_sign)
    for rotations."""
    per_channel = np.asarray(per_channel, dtype=np.float64)
    C = per_channel.shape[0]
    J = len(swap)
    M = np.zeros((J * C, J * C), dtype=np.float64)
    for j, s in enumerate(swap):
        M[s * C:(s + 1) * C, j * C:(j + 1) * C] = per_channel.T
    return M


def _choose_tile_t(T):
    if T <= 8:
        return T
    # Aim for >= 2 grid steps (v7x megacore) with multiple-of-8 tiles,
    # capped so blocks stay tiny on every generation.
    half = -(-T // 2)                      # cdiv(T, 2)
    tile = ((half + 7) // 8) * 8           # round up to multiple of 8
    return max(8, min(tile, _MAX_T_TILE))


# ------------------------------ pallas_call glue -----------------------------
def _run_mirror(arrays_flat, mats, precisions):
    T = arrays_flat[0].shape[0]
    tile_t = _choose_tile_t(T)
    grid = (pl.cdiv(T, tile_t),)

    in_specs = []
    operands = []
    for x, m in zip(arrays_flat, mats):
        in_specs.append(pl.BlockSpec((tile_t, x.shape[1]), lambda t: (t, 0)))
        # Same block index every step -> the matrix stays VMEM-resident.
        in_specs.append(pl.BlockSpec(m.shape, lambda t: (0, 0)))
        operands += [x, m]
    out_specs = tuple(pl.BlockSpec((tile_t, x.shape[1]), lambda t: (t, 0))
                      for x in arrays_flat)

    kernel = _make_mirror_kernel(len(arrays_flat), precisions)
    return pl.pallas_call(
        kernel,
        out_shape=tuple(jax.ShapeDtypeStruct(x.shape, x.dtype)
                        for x in arrays_flat),
        grid=grid,
        in_specs=in_specs,
        out_specs=out_specs,
        compiler_params=pltpu.CompilerParams(
            dimension_semantics=("parallel",)),   # time tiles are independent
    )(*operands)


# --------------------------------- forward ----------------------------------
def mirror_forward(joint_positions, joint_rotations, swap_idx,
                   reflection_matrix, quat_sign):
    """Mirror augmentation forward pass.

    joint_positions: (T, J, 3) or None
    joint_rotations: (T, J, 4) or None
    swap_idx / reflection_matrix / quat_sign: static skeleton configuration
    (numpy / python), matching the module's registered buffers.
    """
    if joint_positions is None and joint_rotations is None:
        return None, None

    swap = tuple(int(s) for s in np.asarray(swap_idx).reshape(-1))
    refl = np.asarray(reflection_matrix, dtype=np.float64)
    qsign = np.asarray(quat_sign, dtype=np.float64).reshape(-1)

    arrays, mats, precisions, shapes = [], [], [], []

    def _add(arr, per_channel):
        T, J, C = arr.shape
        assert len(swap) == J and all(0 <= s < J for s in swap), "bad swap list"
        flat = arr.reshape(T, J * C)          # free row-major reshape (lane-dense)
        M = jnp.asarray(_signed_perm_matrix(swap, per_channel).astype(arr.dtype))
        prec = (lax.Precision.HIGHEST if arr.dtype == jnp.float32
                else lax.Precision.DEFAULT)   # +-1/0 weights are exact in bf16
        arrays.append(flat)
        mats.append(M)
        precisions.append(prec)
        shapes.append((T, J, C))

    if joint_positions is not None:
        _add(joint_positions, refl)             # general 3x3 reflection
    if joint_rotations is not None:
        _add(joint_rotations, np.diag(qsign))   # quaternion sign flip

    T = arrays[0].shape[0]
    for a in arrays:
        assert a.shape[0] == T, "inputs must share T"

    outs = list(_run_mirror(tuple(arrays), tuple(mats), tuple(precisions)))

    results = []
    for (Ti, J, C) in shapes:
        results.append(outs.pop(0).reshape(Ti, J, C))

    new_pos = results.pop(0) if joint_positions is not None else None
    new_rot = results.pop(0) if joint_rotations is not None else None
    return new_pos, new_rot


# ------------------------ module "init" (buffers) ----------------------------
def make_mirror_buffers(sys: str, bone_pair_indices):
    """Static skeleton config: reflection matrix, quaternion sign, swap list."""
    refl = np.eye(3, dtype=np.float32)
    sign = np.ones(4, dtype=np.float32)
    if sys == 'x':
        refl[0, 0] = -1.0
        quat_indices = [2, 3]
    elif sys == 'z':
        refl[2, 2] = -1.0
        quat_indices = [1, 2]
    elif sys == 'y':
        refl[1, 1] = -1.0
        quat_indices = [1, 3]
    else:
        raise ValueError("can't mirror")
    sign[quat_indices] = -1.0
    swap = np.asarray(bone_pair_indices, dtype=np.int32)
    return refl, sign, swap


# --------------------------------- reference ---------------------------------
def mirror_ref(pos, rot, swap_idx, refl, quat_sign):
    si = np.asarray(swap_idx)
    sp = pos[:, si, :]
    new_pos = jnp.einsum('ck,tjk->tjc', jnp.asarray(refl, dtype=pos.dtype), sp,
                         precision=lax.Precision.HIGHEST)
    sr = rot[:, si, :]
    new_rot = sr * jnp.asarray(quat_sign, dtype=rot.dtype)[None, None, :]
    return new_pos, new_rot


if __name__ == "__main__":
    J = 16  # joints

    # deterministic "skeleton": sys='y', left/right bone pairs swap neighbours
    bone_pair_indices = []
    for k in range(0, J, 2):
        bone_pair_indices += [k + 1, k]
    reflection_matrix, quat_sign, swap_idx = make_mirror_buffers(
        'y', bone_pair_indices)

    key = jax.random.PRNGKey(0)

    # ---- small clip (single grid step) ----
    T = 8
    kp, kr, key = jax.random.split(key, 3)
    joint_positions = jax.random.normal(kp, (T, J, 3), dtype=jnp.float32)
    joint_rotations = jax.random.normal(kr, (T, J, 4), dtype=jnp.float32)

    new_pos, new_rot = mirror_forward(joint_positions, joint_rotations,
                                      swap_idx, reflection_matrix, quat_sign)
    jax.block_until_ready((new_pos, new_rot))

    ref_pos, ref_rot = mirror_ref(joint_positions, joint_rotations,
                                  swap_idx, reflection_matrix, quat_sign)
    np.testing.assert_allclose(np.asarray(new_pos), np.asarray(ref_pos),
                               rtol=1e-5, atol=1e-5)
    np.testing.assert_allclose(np.asarray(new_rot), np.asarray(ref_rot),
                               rtol=1e-5, atol=1e-5)

    # positions-only / rotations-only paths (module allows either to be None)
    only_pos, none_rot = mirror_forward(joint_positions, None,
                                        swap_idx, reflection_matrix, quat_sign)
    none_pos, only_rot = mirror_forward(None, joint_rotations,
                                        swap_idx, reflection_matrix, quat_sign)
    jax.block_until_ready((only_pos, only_rot))
    assert none_rot is None and none_pos is None
    np.testing.assert_allclose(np.asarray(only_pos), np.asarray(ref_pos),
                               rtol=1e-5, atol=1e-5)
    np.testing.assert_allclose(np.asarray(only_rot), np.asarray(ref_rot),
                               rtol=1e-5, atol=1e-5)

    # ---- longer clip: exercises multi-tile grid (>=2 steps) + partial block ----
    T2 = 20
    kp2, kr2, key = jax.random.split(key, 3)
    pos2 = jax.random.normal(kp2, (T2, J, 3), dtype=jnp.float32)
    rot2 = jax.random.normal(kr2, (T2, J, 4), dtype=jnp.float32)
    new_pos2, new_rot2 = mirror_forward(pos2, rot2, swap_idx,
                                        reflection_matrix, quat_sign)
    jax.block_until_ready((new_pos2, new_rot2))
    ref_pos2, ref_rot2 = mirror_ref(pos2, rot2, swap_idx,
                                    reflection_matrix, quat_sign)
    np.testing.assert_allclose(np.asarray(new_pos2), np.asarray(ref_pos2),
                               rtol=1e-5, atol=1e-5)
    np.testing.assert_allclose(np.asarray(new_rot2), np.asarray(ref_rot2),
                               rtol=1e-5, atol=1e-5)

    print("KERNEL_OK")
</pallas_src>

<mosaic_0001>
module attributes {stable_mosaic.version = 11 : i64} {
  func.func @kernel(%arg0: i32, %arg1: memref<8x48xf32, #tpu.memory_space<vmem>>, %arg2: memref<48x48xf32, #tpu.memory_space<vmem>>, %arg3: memref<8x64xf32, #tpu.memory_space<vmem>>, %arg4: memref<64x64xf32, #tpu.memory_space<vmem>>, %arg5: memref<8x48xf32, #tpu.memory_space<vmem>>, %arg6: memref<8x64xf32, #tpu.memory_space<vmem>>) attributes {dimension_semantics = [#tpu.dimension_semantics<parallel>], iteration_bounds = array<i64: 1>, scalar_prefetch = 0 : i64, scratch_operands = 0 : i64, tpu.core_type = #tpu.core_type<tc>, window_params = [{transform_indices = @transform_0, window_bounds = array<i64: 8, 48>}, {pipeline_mode = #tpu.pipeline_mode<synchronous>, transform_indices = @transform_1, window_bounds = array<i64: 48, 48>}, {transform_indices = @transform_2, window_bounds = array<i64: 8, 64>}, {pipeline_mode = #tpu.pipeline_mode<synchronous>, transform_indices = @transform_3, window_bounds = array<i64: 64, 64>}, {transform_indices = @transform_4, window_bounds = array<i64: 8, 48>}, {transform_indices = @transform_5, window_bounds = array<i64: 8, 64>}]} {
    %c0 = arith.constant 0 : index
    %c0_0 = arith.constant 0 : index
    %0 = vector.load %arg1[%c0, %c0_0] : memref<8x48xf32, #tpu.memory_space<vmem>>, vector<8x48xf32>
    %c0_1 = arith.constant 0 : index
    %c0_2 = arith.constant 0 : index
    %1 = vector.load %arg2[%c0_1, %c0_2] : memref<48x48xf32, #tpu.memory_space<vmem>>, vector<48x48xf32>
    %cst = arith.constant dense<0.000000e+00> : vector<8x48xf32>
    %2 = tpu.matmul %0, %1, %cst {dimension_numbers = #tpu.dot_dimension_numbers<[1], [0], [0], [1], [0, 0, 1, 1], [], []>, precision = #tpu.contract_precision<fp32>} : vector<8x48xf32>, vector<48x48xf32>, vector<8x48xf32> -> vector<8x48xf32>
    %c0_3 = arith.constant 0 : index
    %c0_4 = arith.constant 0 : index
    %3 = vector.load %arg5[%c0_3, %c0_4] : memref<8x48xf32, #tpu.memory_space<vmem>>, vector<8x48xf32>
    tpu.vector_store %arg5[%c0_3, %c0_4], %2 {strides = array<i32>} : memref<8x48xf32, #tpu.memory_space<vmem>>, vector<8x48xf32>,
    %c0_5 = arith.constant 0 : index
    %c0_6 = arith.constant 0 : index
    %4 = vector.load %arg3[%c0_5, %c0_6] : memref<8x64xf32, #tpu.memory_space<vmem>>, vector<8x64xf32>
    %c0_7 = arith.constant 0 : index
    %c0_8 = arith.constant 0 : index
    %5 = vector.load %arg4[%c0_7, %c0_8] : memref<64x64xf32, #tpu.memory_space<vmem>>, vector<64x64xf32>
    %cst_9 = arith.constant dense<0.000000e+00> : vector<8x64xf32>
    %6 = tpu.matmul %4, %5, %cst_9 {dimension_numbers = #tpu.dot_dimension_numbers<[1], [0], [0], [1], [0, 0, 1, 1], [], []>, precision = #tpu.contract_precision<fp32>} : vector<8x64xf32>, vector<64x64xf32>, vector<8x64xf32> -> vector<8x64xf32>
    %c0_10 = arith.constant 0 : index
    %c0_11 = arith.constant 0 : index
    %7 = vector.load %arg6[%c0_10, %c0_11] : memref<8x64xf32, #tpu.memory_space<vmem>>, vector<8x64xf32>
    tpu.vector_store %arg6[%c0_10, %c0_11], %6 {strides = array<i32>} : memref<8x64xf32, #tpu.memory_space<vmem>>, vector<8x64xf32>,
    return
  }
  func.func @transform_0(%arg0: i32) -> (i32, i32) {
    %c0_i32 = arith.constant 0 : i32
    %c0_i32_0 = arith.constant 0 : i32
    return %arg0, %c0_i32 : i32, i32
  }
  func.func @transform_1(%arg0: i32) -> (i32, i32) {
    %c0_i32 = arith.constant 0 : i32
    %c0_i32_0 = arith.constant 0 : i32
    %c0_i32_1 = arith.constant 0 : i32
    return %c0_i32, %c0_i32_0 : i32, i32
  }
  func.func @transform_2(%arg0: i32) -> (i32, i32) {
    %c0_i32 = arith.constant 0 : i32
    %c0_i32_0 = arith.constant 0 : i32
    return %arg0, %c0_i32 : i32, i32
  }
  func.func @transform_3(%arg0: i32) -> (i32, i32) {
    %c0_i32 = arith.constant 0 : i32
    %c0_i32_0 = arith.constant 0 : i32
    %c0_i32_1 = arith.constant 0 : i32
    return %c0_i32, %c0_i32_0 : i32, i32
  }
  func.func @transform_4(%arg0: i32) -> (i32, i32) {
    %c0_i32 = arith.constant 0 : i32
    %c0_i32_0 = arith.constant 0 : i32
    return %arg0, %c0_i32 : i32, i32
  }
  func.func @transform_5(%arg0: i32) -> (i32, i32) {
    %c0_i32 = arith.constant 0 : i32
    %c0_i32_0 = arith.constant 0 : i32
    return %arg0, %c0_i32 : i32, i32
  }
}

</mosaic_0001>

<bundles_post_ra>
// kernel: tpu_custom_call.1
= control target key start
LH: loop header
LB: loop body
LE: loop exit
PB: predicated region body
PF: predicated region fallthrough
CT: control target
= control target key end

     0   :  { %11 = vsyncpa [#allocation3], 0  ;;  %s1036_s0 = inlined_call_operand.hbm [shape: f32[8,48], index: 0, kind: input, shape index: {}]   ;;  %s1037_s1 = inlined_call_operand.hbm [shape: f32[48,48], index: 1, kind: input, shape index: {}]   ;;  %s1038_s2 = inlined_call_operand.hbm [shape: f32[8,64], index: 2, kind: input, shape index: {}]   ;;  %s1039_s3 = inlined_call_operand.hbm [shape: f32[64,64], index: 3, kind: input, shape index: {}]   ;;  %s1040_s4 = inlined_call_operand.hbm [shape: f32[8,48], index: 4, kind: output, shape index: {0}]   ;;  %s1041_s5 = inlined_call_operand.hbm [shape: f32[8,64], index: 5, kind: output, shape index: {1}]  }
   0x1   :  { %12 = vsyncpa [#allocation6], 0 }
   0x2   :  { %13 = vsyncpa [#allocation9], 0 }
   0x3   :  { %14 = vsyncpa [#allocation4], 0  ;;  %s31_s20 = sshll.u32 %s1037_s1, 4  ;;  %s32_s20 = int_to_ptr.hbm [resolvable:$true] %s31_s20 }
   0x4   :  { %15 = vsyncpa [#allocation12], 0  ;;  %s751_s21 = smov [#allocation5]   ;;  %s21_s25 = sshll.u32 %s1036_s0, 4  ;;  %s22_s25 = int_to_ptr.hbm [resolvable:$true] %s21_s25 }
   0x5   :  { %s33_s22 = sshll.u32 %s751_s21, 4  ;;  %s752_s26 = smov 128   ;;  %s34_s22 = int_to_ptr.vmem [resolvable:$true] %s33_s22 }
   0x6   :  { %s753_s27 = smov 8   ;;  %s754_s28 = smov [#allocation2]  }
   0x7   :  { %39 = dma.hbm_to_vmem [thread:$0]  %s32_s20, 768, %s34_s22, [#allocation6], %s752_s26, %s752_s26, %s753_s27  }
   0x8   :  { %s23_s29 = sshll.u32 %s754_s28, 4  ;;  %s45_s7 = sshll.u32 %s1038_s2, 4  ;;  %s24_s29 = int_to_ptr.vmem [resolvable:$true] %s23_s29  ;;  %s46_s7 = int_to_ptr.hbm [resolvable:$true] %s45_s7 }
   0x9   :  { %26 = dma.hbm_to_vmem [thread:$0]  %s22_s25, 128, %s24_s29, [#allocation3]  }
   0xa   :  { %s55_s9 = sshll.u32 %s1039_s3, 4  ;;  %s755_s10 = smov [#allocation7]   ;;  %s56_s9 = int_to_ptr.hbm [resolvable:$true] %s55_s9 }
   0xb   :  { %s47_s11 = sshll.u32 %s755_s10, 4  ;;  %s756_s0 = smov [#allocation8]   ;;  %s48_s11 = int_to_ptr.vmem [resolvable:$true] %s47_s11 }
   0xc   :  { %50 = dma.hbm_to_vmem [thread:$0]  %s46_s7, 128, %s48_s11, [#allocation6]  }
   0xd   :  { %s57_s12 = sshll.u32 %s756_s0, 4  ;;  %s58_s12 = int_to_ptr.vmem [resolvable:$true] %s57_s12 }
   0xe   :  { %63 = dma.hbm_to_vmem [thread:$0]  %s56_s9, 1024, %s58_s12, [#allocation9], %s752_s26, %s752_s26, %s753_s27  }
   0xf   :  { %741 = dma.done.wait [#allocation3], 128  }
  0x10   :  { %742 = vsyncadd [#allocation3], 4294967168 }
  0x11   :  { %743 = dma.done.wait [#allocation6], 896  }
  0x12   :  { %744 = vsyncadd [#allocation6], 4294966400 }
  0x13   :  { %745 = dma.done.wait [#allocation9], 1024  }
  0x14   :  { %746 = vsyncadd [#allocation9], 4294966272  ;;  %v86_v0 = vld [vmem:[#allocation5 + $0x28] sm:$0xff]  ;;  %v85_v1 = vld [vmem:[#allocation5 + $0x20] sm:$0xff]  ;;  %vm87_vm0 = vcmask 392192   ;;  %vm312_vm1 = vcmask 523264  }
  0x15   :  { %v84_v2 = vld [vmem:[#allocation5 + $0x18] sm:$0xff]  ;;  %v801_v3 = vand.u32 4294901760, %v86_v0  ;;  %v803_v4 = vand.u32 4294901760, %v85_v1  ;;  %v83_v6 = vld [vmem:[#allocation5 + $0x10] sm:$0xff]  ;;  %v82_v7 = vld [vmem:[#allocation5 + $0x8] sm:$0xff]  ;;  %s757_s2 = smov [#allocation10]  }
  0x16   :  { %v805_v5 = vand.u32 4294901760, %v84_v2  ;;  %v81_v8 = vld [vmem:[#allocation5] sm:$0xff]  ;;  %v807_v9 = vand.u32 4294901760, %v83_v6  ;;  %v809_v10 = vand.u32 4294901760, %v82_v7  ;;  %v311_v12 = vld [vmem:[#allocation8 + $0x38] sm:$0xff]  ;;  %v310_v13 = vld [vmem:[#allocation8 + $0x30] sm:$0xff] }
  0x17   :  { %v811_v11 = vand.u32 4294901760, %v81_v8  ;;  %v814_v14 = vsub.f32 %v86_v0, %v801_v3  ;;  %v817_v15 = vsub.f32 %v85_v1, %v803_v4  ;;  %218 = vmatpush.msra.mxu3 %v801_v3  ;;  %102 = vmatpush.msra.mxu0 %v801_v3  ;;  %v824_v17 = vand.u32 4294901760, %v311_v12  ;;  %v309_v18 = vld [vmem:[#allocation8 + $0x28] sm:$0xff]  ;;  %v308_v39 = vld [vmem:[#allocation8 + $0x20] sm:$0xff]  ;;  %v307_v40 = vld [vmem:[#allocation8 + $0x18] sm:$0xff]  ;;  %s559_s3 = sshll.u32 %s757_s2, 4  ;;  %s560_s3 = int_to_ptr.vmem [resolvable:$true] %s559_s3 }
  0x18   :  { %v822_v16 = vsub.f32 %v84_v2, %v805_v5  ;;  %v827_v19 = vsub.f32 %v83_v6, %v807_v9  ;;  %v830_v20 = vsub.f32 %v82_v7, %v809_v10  ;;  %v835_v22 = vand.u32 4294901760, %v310_v13  ;;  %v306_v44 = vld [vmem:[#allocation8 + $0x10] sm:$0xff]  ;;  %v80_v45 = vld [vmem:[#allocation2] sm:$0xff]  ;;  %v305_v53 = vld [vmem:[#allocation8 + $0x8] sm:$0xff]  ;;  %s561_s15 = sshll.u32 %s1040_s4, 4  ;;  %s758_s16 = smov [#allocation11]   ;;  %s562_s15 = int_to_ptr.hbm [resolvable:$true] %s561_s15 }
  0x19   :  { %v833_v21 = vsub.f32 %v81_v8, %v811_v11  ;;  %185 = vmatpush.msra.mxu2 %v814_v14  ;;  %220 = vmatpush.msra.mxu3 %v803_v4  ;;  %v134_v23 = vand.u32 4294901760, %v814_v14  ;;  %v140_v24 = vand.u32 4294901760, %v817_v15  ;;  %v843_v26 = vsub.f32 %v311_v12, %v824_v17  ;;  %v304_v54 = vld [vmem:[#allocation8] sm:$0xff]  ;;  %s570_s17 = sshll.u32 %s758_s16, 4  ;;  %s572_s4 = sshll.u32 %s1041_s5, 4  ;;  %s571_s17 = int_to_ptr.vmem [resolvable:$true] %s570_s17  ;;  %s573_s4 = int_to_ptr.hbm [resolvable:$true] %s572_s4 }
  0x1a   :  { %v146_v25 = vand.u32 4294901760, %v822_v16  ;;  %104 = vmatpush.msra.mxu0 %v803_v4  ;;  %v152_v27 = vand.u32 4294901760, %v827_v19  ;;  %v158_v28 = vand.u32 4294901760, %v830_v20  ;;  %v848_v29 = vand.u32 4294901760, %v309_v18 }
  0x1b   :  { %v851_v30 = vsub.f32 %v310_v13, %v835_v22  ;;  %188 = vmatpush.msra.mxu2 %v817_v15  ;;  %v135_v31 = vsub.f32 %v814_v14, %v134_v23  ;;  %222 = vmatpush.msra.mxu3 %v805_v5  ;;  %v141_v32 = vsub.f32 %v817_v15, %v140_v24  ;;  %v359_v34 = vand.u32 4294901760, %v843_v26  ;;  %v303_v13 = vld [vmem:[#allocation7] sm:$0xff] }
  0x1c   :  { %v147_v33 = vsub.f32 %v822_v16, %v146_v25  ;;  %106 = vmatpush.msra.mxu0 %v805_v5  ;;  %v153_v35 = vsub.f32 %v827_v19, %v152_v27  ;;  %v872_v36 = vsub.f32 %v830_v20, %v158_v28  ;;  %v164_v38 = vand.u32 4294901760, %v833_v21 }
  0x1d   :  { %v365_v37 = vand.u32 4294901760, %v851_v30  ;;  %191 = vmatpush.msra.mxu2 %v822_v16  ;;  %v136_v41 = vand.u32 4294901760, %v135_v31  ;;  %v142_v42 = vand.u32 4294901760, %v141_v32  ;;  %224 = vmatpush.msra.mxu3 %v807_v9  ;;  %v360_v43 = vsub.f32 %v843_v26, %v359_v34 }
  0x1e   :  { %108 = vmatpush.msra.mxu0 %v807_v9  ;;  %v148_v46 = vand.u32 4294901760, %v147_v33  ;;  %v154_v47 = vand.u32 4294901760, %v153_v35  ;;  %v160_v49 = vand.u32 4294901760, %v872_v36  ;;  %v887_v50 = vand.u32 4294901760, %v308_v39 }
  0x1f   :  { %v366_v48 = vsub.f32 %v851_v30, %v365_v37  ;;  %137 = vmatpush.msra.mxu1 %v136_v41  ;;  %194 = vmatpush.msra.mxu2 %v827_v19  ;;  %v890_v51 = vsub.f32 %v309_v18, %v848_v29  ;;  %v892_v52 = vand.u32 4294901760, %v307_v40  ;;  %v361_v55 = vand.u32 4294901760, %v360_v43 }
  0x20   :  { %226 = vmatpush.msra.mxu3 %v809_v10  ;;  %110 = vmatpush.msra.mxu0 %v809_v10  ;;  %v165_v56 = vsub.f32 %v833_v21, %v164_v38  ;;  %v899_v57 = vand.u32 4294901760, %v306_v44  ;;  %v89_v58 = vsel %vm87_vm0, %v80_v45, 0  ;;  %v905_v60 = vsub.f32 %v308_v39, %v887_v50 }
  0x21   :  { %143 = vmatpush.msra.mxu1 %v142_v42  ;;  %197 = vmatpush.msra.mxu2 %v830_v20  ;;  %v371_v59 = vand.u32 4294901760, %v890_v51  ;;  %v908_v61 = vsub.f32 %v307_v40, %v892_v52  ;;  %v910_v62 = vand.u32 4294901760, %v89_v58  ;;  %v367_v63 = vand.u32 4294901760, %v366_v48 }
  0x22   :  { %228 = vmatpush.msra.mxu3 %v811_v11  ;;  %112 = vmatpush.msra.mxu0 %v811_v11  ;;  %v914_v0 = vand.u32 4294901760, %v305_v53  ;;  %v917_v1 = vsub.f32 %v306_v44, %v899_v57  ;;  %v919_v2 = vand.u32 4294901760, %v304_v54  ;;  %v377_v7 = vand.u32 4294901760, %v905_v60 }
  0x23   :  { %149 = vmatpush.msra.mxu1 %v148_v46  ;;  %200 = vmatpush.msra.mxu2 %v833_v21  ;;  %v372_v6 = vsub.f32 %v890_v51, %v371_v59  ;;  %v383_v8 = vand.u32 4294901760, %v908_v61  ;;  %v114_v12 = vsub.f32 %v89_v58, %v910_v62  ;;  %v166_v18 = vand.u32 4294901760, %v165_v56 }
  0x24   :  { %362 = vmatpush.msrb.mxu3 %v361_v55  ;;  %v389_v31 = vand.u32 4294901760, %v917_v1  ;;  %v931_v32 = vsub.f32 %v305_v53, %v914_v0  ;;  %v934_v33 = vsub.f32 %v304_v54, %v919_v2  ;;  %249 = vmatpush.msrb.mxu0 %v134_v23  ;;  %v378_v36 = vsub.f32 %v905_v60, %v377_v7 }
  0x25   :  { %325 = vmatpush.msrb.mxu2 %v824_v17  ;;  %155 = vmatpush.msra.mxu1 %v154_v47  ;;  %v373_v35 = vand.u32 4294901760, %v372_v6  ;;  %v384_v39 = vsub.f32 %v908_v61, %v383_v8  ;;  %v115_v40 = vand.u32 4294901760, %v114_v12  ;;  %v314_v41 = vsel %vm312_vm1, %v303_v13, 0 }
  0x26   :  { %368 = vmatpush.msrb.mxu3 %v367_v63  ;;  %253 = vmatpush.msrb.mxu0 %v140_v24  ;;  %v379_v14 = vand.u32 4294901760, %v378_v36  ;;  %v390_v23 = vsub.f32 %v917_v1, %v389_v31  ;;  %v395_v42 = vand.u32 4294901760, %v931_v32  ;;  %v401_v45 = vand.u32 4294901760, %v934_v33 }
  0x27   :  { %327 = vmatpush.msrb.mxu2 %v835_v22  ;;  %161 = vmatpush.msra.mxu1 %v160_v49  ;;  %v385_v43 = vand.u32 4294901760, %v384_v39  ;;  %v116_v44 = vsub.f32 %v114_v12, %v115_v40  ;;  %v956_v15 = vand.u32 4294901760, %v314_v41 }
  0x28   :  { %374 = vmatpush.msrb.mxu3 %v373_v35  ;;  %257 = vmatpush.msrb.mxu0 %v146_v25  ;;  %v391_v24 = vand.u32 4294901760, %v390_v23  ;;  %v396_v16 = vsub.f32 %v931_v32, %v395_v42 }
  0x29   :  { %329 = vmatpush.msrb.mxu2 %v848_v29  ;;  %167 = vmatpush.msra.mxu1 %v166_v18  ;;  %v117_v25 = vand.u32 4294901760, %v116_v44  ;;  %v341_v46 = vsub.f32 %v314_v41, %v956_v15 }
  0x2a   :  { %380 = vmatpush.msrb.mxu3 %v379_v14  ;;  %261 = vmatpush.msrb.mxu0 %v152_v27 }
  0x2b   :  { %286 = vmatpush.msrb.mxu1 %v801_v3  ;;  %331 = vmatpush.msrb.mxu2 %v887_v50  ;;  %v402_v3 = vsub.f32 %v934_v33, %v401_v45  ;;  %v342_v27 = vand.u32 4294901760, %v341_v46 }
  0x2c   :  { %386 = vmatpush.msrb.mxu3 %v385_v43  ;;  %203 = vmatmul.f32.vlgmr.msra.gmra.mxu2 %v114_v12 }
  0x2d   :  { %288 = vmatpush.msrb.mxu1 %v803_v4  ;;  %333 = vmatpush.msrb.mxu2 %v892_v52  ;;  %v397_v4 = vand.u32 4294901760, %v396_v16  ;;  %v403_v19 = vand.u32 4294901760, %v402_v3 }
  0x2e   :  { %265 = vmatpush.msrb.mxu0 %v158_v28  ;;  %392 = vmatpush.msrb.mxu3 %v391_v24 }
  0x2f   :  { %290 = vmatpush.msrb.mxu1 %v805_v5  ;;  %335 = vmatpush.msrb.mxu2 %v899_v57  ;;  %v343_v5 = vsub.f32 %v341_v46, %v342_v27 }
  0x30   :  { %118 = vmatmul.f32.vlgmr.msra.gmra.mxu0 %v117_v25  ;;  %232 = vmatmul.f32.vlgmr.msra.gmra.mxu3 %v115_v40 }
  0x31   :  { %292 = vmatpush.msrb.mxu1 %v807_v9  ;;  %337 = vmatpush.msrb.mxu2 %v914_v0  ;;  %v344_v9 = vand.u32 4294901760, %v343_v5 }
  0x32   :  { %269 = vmatpush.msrb.mxu0 %v164_v38  ;;  %398 = vmatpush.msrb.mxu3 %v397_v4 }
  0x33   :  { %294 = vmatpush.msrb.mxu1 %v809_v10  ;;  %339 = vmatpush.msrb.mxu2 %v919_v2 }
  0x34   :  { %420 = vmatpush.msra.mxu0 %v843_v26  ;;  %169 = vmatmul.f32.vlgmr.msra.gmra.mxu1 %v910_v62 }
  0x35   :  { %490 = vmatpush.msra.mxu2 %v359_v34  ;;  %404 = vmatpush.msrb.mxu3 %v403_v19 }
  0x36   :  { %296 = vmatpush.msrb.mxu1 %v811_v11  ;;  %423 = vmatpush.msra.mxu0 %v851_v30 }
  0x37   :  { %494 = vmatpush.msra.mxu2 %v365_v37  ;;  %533 = vmatpush.msra.mxu3 %v824_v17 }
  0x38   :  { %457 = vmatpush.msra.mxu1 %v824_v17  ;;  %426 = vmatpush.msra.mxu0 %v890_v51 }
  0x39   :  { %498 = vmatpush.msra.mxu2 %v371_v59  ;;  %535 = vmatpush.msra.mxu3 %v835_v22 }
  0x3a   :  { %459 = vmatpush.msra.mxu1 %v835_v22  ;;  %429 = vmatpush.msra.mxu0 %v905_v60 }
  0x3b   :  { %502 = vmatpush.msra.mxu2 %v377_v7  ;;  %537 = vmatpush.msra.mxu3 %v848_v29 }
  0x3c   :  { %461 = vmatpush.msra.mxu1 %v848_v29  ;;  %271 = vmatmul.f32.vlgmr.msrb.gmra.mxu0 %v910_v62 }
  0x3d   :  { %345 = vmatmul.f32.vlgmr.msrb.gmra.mxu2 %v344_v9  ;;  %406 = vmatmul.f32.vlgmr.msrb.gmra.mxu3 %v956_v15 }
  0x3e   :  { %432 = vmatpush.msra.mxu0 %v908_v61  ;;  %463 = vmatpush.msra.mxu1 %v887_v50 }
  0x3f   :  { %506 = vmatpush.msra.mxu2 %v383_v8  ;;  %539 = vmatpush.msra.mxu3 %v887_v50 }
  0x40   :  { %298 = vmatmul.f32.vlgmr.msrb.gmra.mxu1 %v910_v62  ;;  %435 = vmatpush.msra.mxu0 %v917_v1 }
  0x41   :  { %465 = vmatpush.msra.mxu1 %v892_v52  ;;  %510 = vmatpush.msra.mxu2 %v389_v31 }
  0x42   :  { %541 = vmatpush.msra.mxu3 %v892_v52  ;;  %438 = vmatpush.msra.mxu0 %v931_v32 }
  0x43   :  { %467 = vmatpush.msra.mxu1 %v899_v57  ;;  %514 = vmatpush.msra.mxu2 %v395_v42 }
  0x44   :  { %543 = vmatpush.msra.mxu3 %v899_v57  ;;  %441 = vmatpush.msra.mxu0 %v934_v33 }
  0x45   :  { %469 = vmatpush.msra.mxu1 %v914_v0  ;;  %518 = vmatpush.msra.mxu2 %v401_v45 }
  0x46   :  { %545 = vmatpush.msra.mxu3 %v914_v0  ;;  %444 = vmatmul.f32.vlgmr.msra.gmra.mxu0 %v341_v46 }
  0x47   :  { %520 = vmatmul.f32.vlgmr.msra.gmra.mxu2 %v956_v15  ;;  %471 = vmatpush.msra.mxu1 %v919_v2 }
  0x48   :  { %547 = vmatpush.msra.mxu3 %v919_v2  ;;  %475 = vmatmul.f32.vlgmr.msra.gmra.mxu1 %v342_v27 }
  0x49   :  { %549 = vmatmul.f32.vlgmr.msra.gmra.mxu3 %v956_v15 }
  0xad   :  { %v119_v10 = vpop.f32.mrf.mxu0 }
  0xaf   :  { %v204_v17 = vpop.f32.mrf.mxu2 }
  0xb1   :  { %v170_v11 = vpop.f32.mrf.mxu1 }
  0xb2   :  { %v171_v20 = vadd.f32 %v170_v11, %v119_v10 }
  0xb3   :  { %v233_v21 = vpop.f32.mrf.mxu3 }
  0xb4   :  { %v205_v22 = vadd.f32 %v204_v17, %v171_v20 }
  0xb6   :  { %v234_v26 = vadd.f32 %v233_v21, %v205_v22 }
  0xb9   :  { %v272_v28 = vpop.f32.mrf.mxu0 }
  0xba   :  { %v273_v29 = vadd.f32 %v272_v28, %v234_v26 }
  0xbd   :  { %v299_v30 = vpop.f32.mrf.mxu1 }
  0xbe   :  { %v300_v34 = vadd.f32 %v299_v30, %v273_v29 }
  0xc0   :  { %302 = vst.msk [vmem:[#allocation10] sm:$0xff] %vm87_vm0, %v300_v34  ;;  %v346_v37 = vpop.f32.mrf.mxu2  ;;  %v407_v38 = vpop.f32.mrf.mxu3 }
  0xc1   :  { %v408_v47 = vadd.f32 %v407_v38, %v346_v37  ;;  %564 = dma.vmem_to_hbm [thread:$0]  %s560_s3, 128, %s562_s15, [#allocation4]  }
  0xc3   :  { %v445_v48 = vpop.f32.mrf.mxu0 }
  0xc4   :  { %v446_v49 = vadd.f32 %v445_v48, %v408_v47 }
  0xc5   :  { %v476_v50 = vpop.f32.mrf.mxu1 }
  0xc6   :  { %v477_v51 = vadd.f32 %v476_v50, %v446_v49 }
  0xca   :  { %v521_v52 = vpop.f32.mrf.mxu2 }
  0xcb   :  { %v522_v53 = vadd.f32 %v521_v52, %v477_v51 }
  0xcc   :  { %v550_v54 = vpop.f32.mrf.mxu3 }
  0xcd   :  { %v551_v55 = vadd.f32 %v550_v54, %v522_v53 }
  0xcf   :  { %553 = vst.msk [vmem:[#allocation11] sm:$0xff] %vm312_vm1, %v551_v55 }
  0xd0   :  { %575 = dma.vmem_to_hbm [thread:$0]  %s571_s17, 128, %s573_s4, [#allocation12]  }
  0xd1   :  { %747 = dma.done.wait [#allocation4], 128  }
  0xd2   :  { %748 = vsyncadd [#allocation4], 4294967168 }
  0xd3   :  { %749 = dma.done.wait [#allocation12], 128  }
  0xd4   :  { %750 = vsyncadd [#allocation12], 4294967168 }
  0xd5   :  { %584 = vsyncpa [#allocation3], 1 }
  0xd6   :  { %585 = vsyncpa [#allocation6], 1 }
  0xd7   :  { %586 = vsyncpa [#allocation9], 1 }
  0xd8   :  { %587 = vsyncpa [#allocation4], 1 }
  0xd9   :  { %588 = vsyncpa [#allocation12], 1 }

</bundles_post_ra>
